<compile_context>
chip_gen: v7x
topology: tpu7x:2x2x1
jax: 0.10.0
libtpu: 0.0.40
codegen_flags: <defaults>
</compile_context>

<pallas_src>
import functools

import jax
import jax.numpy as jnp
from jax.experimental import pallas as pl
from jax.experimental.pallas import tpu as pltpu

QMAX_ACT = 255.0   # unsigned 8-bit activations: [0, 255]
QMIN_W = -128.0    # signed 8-bit weights: [-128, 127]
QMAX_W = 127.0


def _round_up(x, m):
    return ((x + m - 1) // m) * m


def _smem():
    # (1, 1) scalar inputs live in SMEM (scalar path), whole-array / no blocking.
    return pl.BlockSpec(memory_space=pltpu.MemorySpace.SMEM)


# --------------------------------------------------------------------------
# Pass 1 / 5: masked global min/max reduction over a padded 2-D array.
# Accumulator (1,1) outputs, init at the first grid step (P3 pattern).
# --------------------------------------------------------------------------
def _minmax_kernel(x_ref, min_ref, max_ref, *, rows, cols, tr, tc):
    i = pl.program_id(0)
    j = pl.program_id(1)

    @pl.when(jnp.logical_and(i == 0, j == 0))
    def _():
        min_ref[...] = jnp.full_like(min_ref, jnp.inf)
        max_ref[...] = jnp.full_like(max_ref, -jnp.inf)

    x = x_ref[...].astype(jnp.float32)
    row_ids = jax.lax.broadcasted_iota(jnp.int32, x.shape, 0) + i * tr
    col_ids = jax.lax.broadcasted_iota(jnp.int32, x.shape, 1) + j * tc
    valid = jnp.logical_and(row_ids < rows, col_ids < cols)
    min_ref[...] = jnp.minimum(min_ref[...], jnp.min(jnp.where(valid, x, jnp.inf)))
    max_ref[...] = jnp.maximum(max_ref[...], jnp.max(jnp.where(valid, x, -jnp.inf)))


def _global_minmax(x_p, rows, cols, tr, tc):
    gr, gc = x_p.shape[0] // tr, x_p.shape[1] // tc
    kernel = functools.partial(_minmax_kernel, rows=rows, cols=cols, tr=tr, tc=tc)
    return pl.pallas_call(
        kernel,
        out_shape=(jax.ShapeDtypeStruct((1, 1), jnp.float32),
                   jax.ShapeDtypeStruct((1, 1), jnp.float32)),
        grid=(gr, gc),
        in_specs=[pl.BlockSpec((tr, tc), lambda i, j: (i, j))],
        out_specs=(pl.BlockSpec((1, 1), lambda i, j: (0, 0)),
                   pl.BlockSpec((1, 1), lambda i, j: (0, 0))),
        compiler_params=pltpu.CompilerParams(
            dimension_semantics=("arbitrary", "arbitrary")),
    )(x_p)


# --------------------------------------------------------------------------
# Pass 2: quantize x to centered integer values stored in bf16 (exact).
# --------------------------------------------------------------------------
def _act_quant_int_kernel(mn_ref, mx_ref, x_ref, xc_ref):
    mn = mn_ref[0, 0]
    mx = mx_ref[0, 0]
    skip = (mx - mn) < 1e-8
    scale = jnp.where(skip, 1.0, (mx - mn) * (1.0 / QMAX_ACT))
    zp = jnp.clip(0.0 - jnp.round(mn / scale), 0.0, QMAX_ACT)
    inv_scale = 1.0 / scale                      # reciprocal-multiply on the big tensor
    x = x_ref[...].astype(jnp.float32)
    x_int = jnp.clip(jnp.round(x * inv_scale + zp), 0.0, QMAX_ACT)
    xc = jnp.where(skip, x, x_int - zp)          # in [-255, 255]: exact in bf16
    # TODO(synk): in the degenerate skip branch (max-min < 1e-8) the raw f32 x is
    # rounded to bf16 before the MXU; exactness is only guaranteed on the
    # quantized path (which is the only path exercised by non-constant inputs).
    xc_ref[...] = xc.astype(jnp.bfloat16)


# --------------------------------------------------------------------------
# Pass 3: one-time per-output-channel symmetric weight quant on W^T (K, N).
# Produces integer values in bf16 (no dequantized f32 weight tensor) + scales.
# --------------------------------------------------------------------------
def _weight_quant_kernel(w_ref, wint_ref, scale_ref):
    w = w_ref[...].astype(jnp.float32)                 # (Kp, TN)
    w_min = jnp.min(w, axis=0, keepdims=True)          # (1, TN)
    w_max = jnp.max(w, axis=0, keepdims=True)
    ranges = jnp.maximum(jnp.abs(w_min), jnp.abs(w_max))
    scale = jnp.maximum(ranges * (1.0 / QMAX_W), 1e-8)
    w_int = jnp.clip(jnp.round(w * (1.0 / scale)), QMIN_W, QMAX_W)
    wint_ref[...] = w_int.astype(jnp.bfloat16)         # exact ints in bf16
    scale_ref[...] = scale


# --------------------------------------------------------------------------
# Pass 4: canonical tiled matmul, K-accumulation in an f32 VMEM scratch.
# y = s_x * (Xc @ W_int) * s_w + b, applied once per output tile at k == last.
# --------------------------------------------------------------------------
def _matmul_kernel(mn_ref, mx_ref, xc_ref, w_ref, ws_ref, b_ref, y_ref, acc_ref):
    k = pl.program_id(2)

    @pl.when(k == 0)
    def _():
        acc_ref[...] = jnp.zeros_like(acc_ref)

    acc_ref[...] += jnp.dot(xc_ref[...], w_ref[...],
                            preferred_element_type=jnp.float32)

    @pl.when(k == pl.num_programs(2) - 1)
    def _():
        mn = mn_ref[0, 0]
        mx = mx_ref[0, 0]
        s_x = jnp.where((mx - mn) < 1e-8, 1.0, (mx - mn) * (1.0 / QMAX_ACT))
        y_ref[...] = acc_ref[...] * (s_x * ws_ref[...]) + b_ref[...]


# --------------------------------------------------------------------------
# Pass 6: asymmetric fake-quant of the output with its global min/max.
# --------------------------------------------------------------------------
def _act_fake_quant_kernel(mn_ref, mx_ref, y_ref, o_ref):
    mn = mn_ref[0, 0]
    mx = mx_ref[0, 0]
    skip = (mx - mn) < 1e-8
    scale = jnp.where(skip, 1.0, (mx - mn) * (1.0 / QMAX_ACT))
    zp = jnp.clip(0.0 - jnp.round(mn / scale), 0.0, QMAX_ACT)
    inv_scale = 1.0 / scale
    y = y_ref[...].astype(jnp.float32)
    y_int = jnp.clip(jnp.round(y * inv_scale + zp), 0.0, QMAX_ACT)
    y_q = jnp.where(skip, y, (y_int - zp) * scale)
    o_ref[...] = y_q.astype(o_ref.dtype)


# --------------------------------------------------------------------------
# Wrapper
# --------------------------------------------------------------------------
def advanced_bit_linear(x, weight, bias=None):
    """x: (..., in_features); weight: (out_features, in_features); bias: (out_features,)."""
    n_out, k_in = weight.shape
    lead = x.shape[:-1]
    x2 = x.reshape(-1, k_in)
    m = x2.shape[0]
    if bias is None:
        bias = jnp.zeros((n_out,), dtype=jnp.float32)

    # ---- tile plan (fits comfortably in the 32 MiB scoped-VMEM default on
    # v5e/v6e and under the 64 MiB physical VMEM on v7x, with double buffering).
    tm = min(256, _round_up(m, 16))          # sublane-aligned (bf16 tile = (16, 128))
    tn = min(256, _round_up(n_out, 128))     # lane-dense output stores
    tk = k_in if k_in <= 1024 else 512       # single K step for moderate K
    mp = _round_up(m, tm)
    np_ = _round_up(n_out, tn)
    kp = _round_up(k_in, tk)

    f32 = jnp.float32
    x_p = jnp.pad(x2.astype(f32), ((0, mp - m), (0, kp - k_in)))
    # One-time layout plumbing: pre-transpose W so the matmul is (M,K)x(K,N)
    # with no per-tile transpose inside the hot kernel.
    wt_p = jnp.pad(weight.astype(f32).T, ((0, kp - k_in), (0, np_ - n_out)))
    b_p = jnp.pad(bias.astype(f32).reshape(1, n_out), ((0, 0), (0, np_ - n_out)))

    # ---- pass 1: global min/max of x (masked to the un-padded region)
    x_min, x_max = _global_minmax(x_p, m, k_in, tm, tk)

    # ---- pass 2: x -> centered integer values in bf16 (halves x DMA in pass 4)
    xc = pl.pallas_call(
        _act_quant_int_kernel,
        out_shape=jax.ShapeDtypeStruct((mp, kp), jnp.bfloat16),
        grid=(mp // tm, kp // tk),
        in_specs=[_smem(), _smem(),
                  pl.BlockSpec((tm, tk), lambda i, j: (i, j))],
        out_specs=pl.BlockSpec((tm, tk), lambda i, j: (i, j)),
        compiler_params=pltpu.CompilerParams(
            dimension_semantics=("parallel", "parallel")),
    )(x_min, x_max, x_p)

    # ---- pass 3: one-time weight quantization (hoisted out of the matmul loop)
    w_int, w_scale = pl.pallas_call(
        _weight_quant_kernel,
        out_shape=(jax.ShapeDtypeStruct((kp, np_), jnp.bfloat16),
                   jax.ShapeDtypeStruct((1, np_), jnp.float32)),
        grid=(np_ // tn,),
        in_specs=[pl.BlockSpec((kp, tn), lambda j: (0, j))],
        out_specs=(pl.BlockSpec((kp, tn), lambda j: (0, j)),
                   pl.BlockSpec((1, tn), lambda j: (0, j))),
        compiler_params=pltpu.CompilerParams(
            dimension_semantics=("parallel",),
            vmem_limit_bytes=32 * 1024 * 1024),
    )(wt_p)
    # TODO(synk): for very large K (kp*tn tiles beyond the VMEM budget) this
    # one-time pass would need a two-stage column-wise min/max reduction.

    # ---- pass 4: tiled, integer-factored matmul on the bf16 MXU path
    gm, gn, gk = mp // tm, np_ // tn, kp // tk
    cost = pl.CostEstimate(
        flops=2 * mp * np_ * kp,
        transcendentals=0,
        bytes_accessed=2 * mp * kp * gn + 2 * kp * np_ * gm + 4 * mp * np_)
    y = pl.pallas_call(
        _matmul_kernel,
        out_shape=jax.ShapeDtypeStruct((mp, np_), jnp.float32),
        grid=(gm, gn, gk),
        in_specs=[_smem(), _smem(),
                  pl.BlockSpec((tm, tk), lambda i, j, k: (i, k)),
                  pl.BlockSpec((tk, tn), lambda i, j, k: (k, j)),
                  pl.BlockSpec((1, tn), lambda i, j, k: (0, j)),
                  pl.BlockSpec((1, tn), lambda i, j, k: (0, j))],
        out_specs=pl.BlockSpec((tm, tn), lambda i, j, k: (i, j)),
        scratch_shapes=[pltpu.VMEM((tm, tn), jnp.float32)],
        compiler_params=pltpu.CompilerParams(
            dimension_semantics=("parallel", "parallel", "arbitrary"),
            vmem_limit_bytes=32 * 1024 * 1024),
        cost_estimate=cost,
    )(x_min, x_max, xc, w_int, w_scale, b_p)

    # ---- pass 5: global min/max of y (masked; padded rows/cols excluded)
    y_min, y_max = _global_minmax(y, m, n_out, tm, tn)

    # ---- pass 6: output fake-quant
    out_p = pl.pallas_call(
        _act_fake_quant_kernel,
        out_shape=jax.ShapeDtypeStruct((mp, np_), x.dtype),
        grid=(gm, gn),
        in_specs=[_smem(), _smem(),
                  pl.BlockSpec((tm, tn), lambda i, j: (i, j))],
        out_specs=pl.BlockSpec((tm, tn), lambda i, j: (i, j)),
        compiler_params=pltpu.CompilerParams(
            dimension_semantics=("parallel", "parallel")),
    )(y_min, y_max, y)

    return out_p[:m, :n_out].reshape(lead + (n_out,))


# --------------------------------------------------------------------------
# Pure-JAX reference of the training-mode PyTorch forward.
# --------------------------------------------------------------------------
def _reference(x, weight, bias):
    x = x.astype(jnp.float32)
    w = weight.astype(jnp.float32)

    def act_fq(t):
        mn, mx = jnp.min(t), jnp.max(t)
        skip = (mx - mn) < 1e-8
        scale = jnp.where(skip, 1.0, (mx - mn) / QMAX_ACT)
        zp = jnp.clip(0.0 - jnp.round(mn / scale), 0.0, QMAX_ACT)
        t_int = jnp.clip(jnp.round(t / scale + zp), 0.0, QMAX_ACT)
        return jnp.where(skip, t, (t_int - zp) * scale)

    x_q = act_fq(x)
    ranges = jnp.maximum(jnp.abs(jnp.min(w, axis=1)), jnp.abs(jnp.max(w, axis=1)))
    w_scale = jnp.maximum(ranges / QMAX_W, 1e-8)[:, None]
    w_q = jnp.clip(jnp.round(w / w_scale), QMIN_W, QMAX_W) * w_scale
    y = jnp.einsum("...k,nk->...n", x_q, w_q) + bias
    return act_fq(y)


if __name__ == "__main__":
    # Small shapes: batch=2, seq=8, in_features=32, out_features=64
    batch, seq, in_features, out_features = 2, 8, 32, 64

    key = jax.random.PRNGKey(0)
    kx, kw = jax.random.split(key)
    x = jax.random.normal(kx, (batch, seq, in_features), dtype=jnp.float32)
    weight = jax.random.normal(kw, (out_features, in_features), dtype=jnp.float32) * 0.02
    bias = jnp.zeros((out_features,), dtype=jnp.float32)

    out = advanced_bit_linear(x, weight, bias)
    out = jax.block_until_ready(out)
    assert out.shape == (batch, seq, out_features)

    ref = _reference(x, weight, bias)
    err = float(jnp.max(jnp.abs(out - ref)))
    # Generous tolerance: a fake-quant rounding decision can flip by one step
    # vs the f32 reference when a value lands exactly on a rounding boundary.
    assert err < 2e-2, err

    print("KERNEL_OK")
</pallas_src>

<mosaic_0001>
module attributes {stable_mosaic.version = 11 : i64} {
  func.func @_minmax_kernel(%arg0: i32, %arg1: i32, %arg2: memref<16x32xf32, #tpu.memory_space<vmem>>, %arg3: memref<1x1xf32, #tpu.memory_space<vmem>>, %arg4: memref<1x1xf32, #tpu.memory_space<vmem>>) attributes {dimension_semantics = [#tpu.dimension_semantics<arbitrary>, #tpu.dimension_semantics<arbitrary>], iteration_bounds = array<i64: 1, 1>, scalar_prefetch = 0 : i64, scratch_operands = 0 : i64, tpu.core_type = #tpu.core_type<tc>, window_params = [{transform_indices = @transform_0, window_bounds = array<i64: 16, 32>}, {pipeline_mode = #tpu.pipeline_mode<synchronous>, transform_indices = @transform_1, window_bounds = array<i64: 1, 1>}, {pipeline_mode = #tpu.pipeline_mode<synchronous>, transform_indices = @transform_2, window_bounds = array<i64: 1, 1>}]} {
    %c0_i32 = arith.constant 0 : i32
    %0 = arith.cmpi eq, %arg0, %c0_i32 : i32
    %c0_i32_0 = arith.constant 0 : i32
    %1 = arith.cmpi eq, %arg1, %c0_i32_0 : i32
    %2 = arith.andi %0, %1 : i1
    %3 = arith.extui %2 : i1 to i32
    %c0_i32_1 = arith.constant 0 : i32
    %4 = arith.cmpi ne, %3, %c0_i32_1 : i32
    scf.if %4 {
      %cst_16 = arith.constant 0x7F800000 : f32
      %39 = vector.broadcast %cst_16 : f32 to vector<1x1xf32>
      %c0_17 = arith.constant 0 : index
      %c0_18 = arith.constant 0 : index
      %40 = vector.load %arg3[%c0_17, %c0_18] : memref<1x1xf32, #tpu.memory_space<vmem>>, vector<1x1xf32>
      tpu.vector_store %arg3[%c0_17, %c0_18], %39 {strides = array<i32>} : memref<1x1xf32, #tpu.memory_space<vmem>>, vector<1x1xf32>,
      %cst_19 = arith.constant 0xFF800000 : f32
      %41 = vector.broadcast %cst_19 : f32 to vector<1x1xf32>
      %c0_20 = arith.constant 0 : index
      %c0_21 = arith.constant 0 : index
      %42 = vector.load %arg4[%c0_20, %c0_21] : memref<1x1xf32, #tpu.memory_space<vmem>>, vector<1x1xf32>
      tpu.vector_store %arg4[%c0_20, %c0_21], %41 {strides = array<i32>} : memref<1x1xf32, #tpu.memory_space<vmem>>, vector<1x1xf32>,
    } else {
    }
    %c0 = arith.constant 0 : index
    %c0_2 = arith.constant 0 : index
    %5 = vector.load %arg2[%c0, %c0_2] : memref<16x32xf32, #tpu.memory_space<vmem>>, vector<16x32xf32>
    %6 = tpu.iota {dimensions = array<i32: 0>} : vector<16x32xi32>
    %c16_i32 = arith.constant 16 : i32
    %7 = arith.muli %arg0, %c16_i32 : i32
    %8 = vector.broadcast %7 : i32 to vector<16x32xi32>
    %9 = arith.addi %6, %8 : vector<16x32xi32>
    %10 = tpu.iota {dimensions = array<i32: 1>} : vector<16x32xi32>
    %c32_i32 = arith.constant 32 : i32
    %11 = arith.muli %arg1, %c32_i32 : i32
    %12 = vector.broadcast %11 : i32 to vector<16x32xi32>
    %13 = arith.addi %10, %12 : vector<16x32xi32>
    %c16_i32_3 = arith.constant 16 : i32
    %14 = vector.broadcast %c16_i32_3 : i32 to vector<16x32xi32>
    %15 = arith.cmpi slt, %9, %14 : vector<16x32xi32>
    %c32_i32_4 = arith.constant 32 : i32
    %16 = vector.broadcast %c32_i32_4 : i32 to vector<16x32xi32>
    %17 = arith.cmpi slt, %13, %16 : vector<16x32xi32>
    %18 = arith.andi %15, %17 : vector<16x32xi1>
    %c0_5 = arith.constant 0 : index
    %c0_6 = arith.constant 0 : index
    %19 = vector.load %arg3[%c0_5, %c0_6] : memref<1x1xf32, #tpu.memory_space<vmem>>, vector<1x1xf32>
    %cst = arith.constant 0x7F800000 : f32
    %20 = vector.broadcast %cst : f32 to vector<16x32xf32>
    %21 = arith.select %18, %5, %20 : vector<16x32xi1>, vector<16x32xf32>
    %22 = vector.shape_cast %21 : vector<16x32xf32> to vector<1x16x32xf32>
    %cst_7 = arith.constant dense<0x7F800000> : vector<1xf32>
    %23 = vector.multi_reduction <minimumf>, %22, %cst_7 [1, 2] : vector<1x16x32xf32> to vector<1xf32>
    %24 = vector.shape_cast %23 : vector<1xf32> to vector<1x1x1xf32>
    %25 = vector.extract %24[0, 0, 0] : f32 from vector<1x1x1xf32>
    %26 = vector.broadcast %25 : f32 to vector<1x1xf32>
    %27 = arith.minimumf %19, %26 : vector<1x1xf32>
    %c0_8 = arith.constant 0 : index
    %c0_9 = arith.constant 0 : index
    %28 = vector.load %arg3[%c0_8, %c0_9] : memref<1x1xf32, #tpu.memory_space<vmem>>, vector<1x1xf32>
    tpu.vector_store %arg3[%c0_8, %c0_9], %27 {strides = array<i32>} : memref<1x1xf32, #tpu.memory_space<vmem>>, vector<1x1xf32>,
    %c0_10 = arith.constant 0 : index
    %c0_11 = arith.constant 0 : index
    %29 = vector.load %arg4[%c0_10, %c0_11] : memref<1x1xf32, #tpu.memory_space<vmem>>, vector<1x1xf32>
    %cst_12 = arith.constant 0xFF800000 : f32
    %30 = vector.broadcast %cst_12 : f32 to vector<16x32xf32>
    %31 = arith.select %18, %5, %30 : vector<16x32xi1>, vector<16x32xf32>
    %32 = vector.shape_cast %31 : vector<16x32xf32> to vector<1x16x32xf32>
    %cst_13 = arith.constant dense<0xFF800000> : vector<1xf32>
    %33 = vector.multi_reduction <maximumf>, %32, %cst_13 [1, 2] : vector<1x16x32xf32> to vector<1xf32>
    %34 = vector.shape_cast %33 : vector<1xf32> to vector<1x1x1xf32>
    %35 = vector.extract %34[0, 0, 0] : f32 from vector<1x1x1xf32>
    %36 = vector.broadcast %35 : f32 to vector<1x1xf32>
    %37 = arith.maximumf %29, %36 : vector<1x1xf32>
    %c0_14 = arith.constant 0 : index
    %c0_15 = arith.constant 0 : index
    %38 = vector.load %arg4[%c0_14, %c0_15] : memref<1x1xf32, #tpu.memory_space<vmem>>, vector<1x1xf32>
    tpu.vector_store %arg4[%c0_14, %c0_15], %37 {strides = array<i32>} : memref<1x1xf32, #tpu.memory_space<vmem>>, vector<1x1xf32>,
    return
  }
  func.func @transform_0(%arg0: i32, %arg1: i32) -> (i32, i32) {
    %c0_i32 = arith.constant 0 : i32
    return %arg0, %arg1 : i32, i32
  }
  func.func @transform_1(%arg0: i32, %arg1: i32) -> (i32, i32) {
    %c0_i32 = arith.constant 0 : i32
    %c0_i32_0 = arith.constant 0 : i32
    %c0_i32_1 = arith.constant 0 : i32
    return %c0_i32, %c0_i32_0 : i32, i32
  }
  func.func @transform_2(%arg0: i32, %arg1: i32) -> (i32, i32) {
    %c0_i32 = arith.constant 0 : i32
    %c0_i32_0 = arith.constant 0 : i32
    %c0_i32_1 = arith.constant 0 : i32
    return %c0_i32, %c0_i32_0 : i32, i32
  }
}

</mosaic_0001>

<bundles_post_ra>
// kernel: tpu_custom_call.1
= control target key start
LH: loop header
LB: loop body
LE: loop exit
PB: predicated region body
PF: predicated region fallthrough
CT: control target
= control target key end

     0   :  { %8 = vsyncpa [#allocation3], 0  ;;  %s266_s0 = inlined_call_operand.hbm [shape: f32[16,32], index: 0, kind: input, shape index: {}]   ;;  %s267_s1 = inlined_call_operand.hbm [shape: f32[1,1], index: 1, kind: output, shape index: {0}]   ;;  %s268_s2 = inlined_call_operand.hbm [shape: f32[1,1], index: 2, kind: output, shape index: {1}]  }
   0x1   :  { %9 = vsyncpa [#allocation4], 0 }
   0x2   :  { %10 = vsyncpa [#allocation7], 0  ;;  %s204_s9 = smov [#allocation2]   ;;  %s132_s13 = scalar_lea.hbm %s266_s0, 256 }
   0x3   :  { %s16_s10 = sshll.u32 %s204_s9, 4  ;;  %p133_p0 = scmp.ne.s32.totalorder %s266_s0, %s132_s13  ;;  %s17_s10 = int_to_ptr.vmem [resolvable:$true] %s16_s10 }
   0x4   :  { %p136_p1 = scmp.lt.u32.totalorder %s132_s13, %s266_s0 }
   0x6   :  { %p138_p2 = pnand %p136_p1, %p133_p0 }
   0x8   :  { %141 = shalt.err (!%p138_p2)
}
   0x9   :  { %s142_s18 = scalar_lea.vmem %s17_s10, 256  ;;  %p147_p4 = scmp.lt.s32.totalorder %s17_s10, %s17_s10 }
   0xa   :  { %p143_p3 = scmp.ne.s32.totalorder %s17_s10, %s142_s18  ;;  %p148_p5 = scmp.lt.s32.totalorder %s142_s18, %s142_s18 }
   0xc   :  { %p149_p6 = por %p148_p5, %p147_p4 }
   0xe   :  { %p150_p7 = pnand %p149_p6, %p143_p3 }
  0x10   :  { %153 = shalt.err (!%p150_p7)
}
  0x11   :  { %s205_s19 = smov 128   ;;  %s206_s20 = smov 8  }
  0x12   :  { %22 = dma.hbm_to_vmem [thread:$0]  %s266_s0, 256, %s17_s10, [#allocation3], %s205_s19, %s205_s19, %s206_s20  }
  0x13   :  { %198 = dma.done.wait [#allocation3], 256  }
  0x14   :  { %199 = vsyncadd [#allocation3], 4294967040  ;;  %vm32_vm0 = vcmask 0   ;;  %v44_v0 = vlaneseq  ;;  %v207_v1 = vmov inf   ;;  %v208_v2 = vmov -inf   ;;  %v35_v4 = vld [vmem:[#allocation2] sm:$0xff] }
  0x15   :  { %33 = vst.msk [vmem:[#allocation5] sm:$0x1] %vm32_vm0, %v207_v1  ;;  %34 = vst.msk [vmem:[#allocation6] sm:$0x1] %vm32_vm0, %v208_v2  ;;  %vm57_vm2 = vcmask 261120   ;;  %v36_v5 = vld [vmem:[#allocation2 + $0x8] sm:$0xff] }
  0x16   :  { %v45_v3 = vand.u32 127, %v44_v0  ;;  %s209_s0 = smov [#allocation5]   ;;  %s210_s25 = smov [#allocation6]  }
  0x17   :  { %s98_s23 = sshll.u32 %s209_s0, 4  ;;  %s108_s26 = sshll.u32 %s210_s25, 4  ;;  %s99_s23 = int_to_ptr.vmem [resolvable:$true] %s98_s23  ;;  %s109_s26 = int_to_ptr.vmem [resolvable:$true] %s108_s26 }
  0x18   :  { %vm51_vm1 = vcmp.lt.s32.totalorder %v45_v3, 32  ;;  %s154_s28 = scalar_lea.vmem %s99_s23, 16  ;;  %s158_s29 = scalar_lea.vmem %s99_s23, 32 }
  0x19   :  { %v55_v6 = vsel %vm51_vm1, %v35_v4, inf  ;;  %v56_v7 = vsel %vm51_vm1, %v36_v5, inf  ;;  %v75_v8 = vsel %vm51_vm1, %v35_v4, -inf  ;;  %v76_v9 = vsel %vm51_vm1, %v36_v5, -inf  ;;  %p155_p8 = scmp.ne.s32.totalorder %s99_s23, %s154_s28  ;;  %p159_p9 = scmp.lt.s32.totalorder %s99_s23, %s99_s23 }
  0x1a   :  { %v58_v10 = vsel %vm57_vm2, %v55_v6, inf  ;;  %v59_v11 = vsel %vm57_vm2, %v56_v7, inf  ;;  %v77_v12 = vsel %vm57_vm2, %v75_v8, -inf  ;;  %v78_v13 = vsel %vm57_vm2, %v76_v9, -inf  ;;  %p160_p10 = scmp.lt.s32.totalorder %s158_s29, %s154_s28 }
  0x1b   :  { %v60_v14 = vmin.f32 %v58_v10, %v59_v11  ;;  %v79_v15 = vmax.f32 %v77_v12, %v78_v13 }
  0x1c   :  { %v54_v30 = vld [vmem:[#allocation5] sm:$0x1]  ;;  %v74_v33 = vld [vmem:[#allocation6] sm:$0x1]  ;;  %p161_p11 = por %p160_p10, %p159_p9 }
  0x1d   :  { %61 = vmin.xlane.f32.xlu0 %v60_v14 }
  0x1e   :  { %p162_p12 = pnand %p161_p11, %p155_p8 }
  0x21   :  { %80 = vmax.xlane.f32.xlu0 %v79_v15 }
  0xaa   :  { %v62_v16 = vpop.xlane.xlu0 %61 }
  0xab   :  { %v63_v17 = vrot.slane %v62_v16, 4 }
  0xad   :  { %v64_v18 = vmin.f32 %v62_v16, %v63_v17 }
  0xae   :  { %v81_v19 = vpop.xlane.xlu0 %80 }
  0xaf   :  { %v65_v20 = vrot.slane %v64_v18, 2  ;;  %v82_v21 = vrot.slane %v81_v19, 4 }
  0xb1   :  { %v83_v22 = vmax.f32 %v81_v19, %v82_v21  ;;  %v66_v23 = vmin.f32 %v64_v18, %v65_v20 }
  0xb3   :  { %v84_v24 = vrot.slane %v83_v22, 2  ;;  %v67_v25 = vrot.slane %v66_v23, 1 }
  0xb5   :  { %v85_v26 = vmax.f32 %v83_v22, %v84_v24  ;;  %v68_v27 = vmin.f32 %v66_v23, %v67_v25 }
  0xb7   :  { %121 = vpush %v68_v27  ;;  %v86_v28 = vrot.slane %v85_v26, 1 }
  0xb9   :  { %v87_v29 = vmax.f32 %v85_v26, %v86_v28 }
  0xbb   :  { %123 = vpush %v87_v29 }
  0xe8   :  { %s122_s24 = spop %121 }
  0xe9   :  { %v70_v31 = vstv %s122_s24 }
  0xea   :  { %v71_v32 = vmin.f32 %v54_v30, %v70_v31 }
  0xec   :  { %73 = vst.msk [vmem:[#allocation5] sm:$0x1] %vm32_vm0, %v71_v32  ;;  %s124_s27 = spop %123 }
  0xed   :  { %v89_v34 = vstv %s124_s27 }
  0xee   :  { %165 = shalt.err (!%p162_p12)
}
  0xef   :  { %s166_s4 = scalar_lea.hbm %s267_s1, 16 }
  0xf0   :  { %p167_p13 = scmp.ne.s32.totalorder %s267_s1, %s166_s4  ;;  %p170_p0 = scmp.lt.u32.totalorder %s166_s4, %s267_s1 }
  0xf2   :  { %p172_p1 = pnand %p170_p0, %p167_p13 }
  0xf4   :  { %175 = shalt.err (!%p172_p1)
}
  0xf5   :  { %101 = dma.vmem_to_hbm [thread:$0]  %s99_s23, 16, %s267_s1, [#allocation4]   ;;  %v90_v35 = vmax.f32 %v74_v33, %v89_v34 }
  0xf6   :  { %s176_s11 = scalar_lea.vmem %s109_s26, 16  ;;  %s180_s12 = scalar_lea.vmem %s109_s26, 32 }
  0xf7   :  { %91 = vst.msk [vmem:[#allocation6] sm:$0x1] %vm32_vm0, %v90_v35  ;;  %p177_p2 = scmp.ne.s32.totalorder %s109_s26, %s176_s11  ;;  %p181_p3 = scmp.lt.s32.totalorder %s109_s26, %s109_s26 }
  0xf8   :  { %p182_p4 = scmp.lt.s32.totalorder %s180_s12, %s176_s11 }
  0xfa   :  { %p183_p5 = por %p182_p4, %p181_p3 }
  0xfc   :  { %p184_p6 = pnand %p183_p5, %p177_p2 }
  0xfe   :  { %187 = shalt.err (!%p184_p6)
}
  0xff   :  { %s188_s15 = scalar_lea.hbm %s268_s2, 16 }
 0x100   :  { %p189_p7 = scmp.ne.s32.totalorder %s268_s2, %s188_s15  ;;  %p192_p8 = scmp.lt.u32.totalorder %s188_s15, %s268_s2 }
 0x102   :  { %p194_p9 = pnand %p192_p8, %p189_p7 }
 0x104   :  { %197 = shalt.err (!%p194_p9)
}
 0x105   :  { %111 = dma.vmem_to_hbm [thread:$0]  %s109_s26, 16, %s268_s2, [#allocation7]  }
 0x106   :  { %200 = dma.done.wait [#allocation4], 16  }
 0x107   :  { %201 = vsyncadd [#allocation4], 4294967280 }
 0x108   :  { %202 = dma.done.wait [#allocation7], 16  }
 0x109   :  { %203 = vsyncadd [#allocation7], 4294967280 }
 0x10a   :  { %118 = vsyncpa [#allocation3], 1 }
 0x10b   :  { %119 = vsyncpa [#allocation4], 1 }
 0x10c   :  { %120 = vsyncpa [#allocation7], 1 }

</bundles_post_ra>
